<compile_context>
chip_gen: v7x
topology: tpu7x:2x2x1
jax: 0.10.0
libtpu: 0.0.40
codegen_flags: <defaults>
</compile_context>

<pallas_src>
import functools

import jax
import jax.numpy as jnp
from jax.experimental import pallas as pl
from jax.experimental.pallas import tpu as pltpu

LANES = 128
_EPS = 1e-8


def _contrastive_head_kernel(feats_ref, protos_ref, o_ref, acc_ref, *,
                             sample_num, n_rows, block_rows):
    i = pl.program_id(0)

    @pl.when(i == 0)
    def _():
        acc_ref[...] = jnp.zeros_like(acc_ref)

    f = feats_ref[...].astype(jnp.float32)          # (block_rows, Cp)
    p = protos_ref[...].astype(jnp.float32)         # (8, Cp): row 0 = pos proto, row 1 = neg proto
    p0 = p[0:1, :]                                  # (1, Cp)
    p1 = p[1:2, :]

    # cosine similarity against both prototypes (zero-padded lanes contribute 0)
    f_norm = jnp.maximum(jnp.sqrt(jnp.sum(f * f, axis=-1, keepdims=True)), _EPS)
    p0_norm = jnp.maximum(jnp.sqrt(jnp.sum(p0 * p0, axis=-1, keepdims=True)), _EPS)
    p1_norm = jnp.maximum(jnp.sqrt(jnp.sum(p1 * p1, axis=-1, keepdims=True)), _EPS)

    dot0 = jnp.sum(f * p0, axis=-1, keepdims=True)  # (block_rows, 1)
    dot1 = jnp.sum(f * p1, axis=-1, keepdims=True)

    sim_pos = dot0 / (f_norm * p0_norm)
    sim_neg = dot1 / (f_norm * p1_norm)

    # global row index -> label (first sample_num rows are label 0 / pos class)
    row = jax.lax.broadcasted_iota(jnp.int32, (block_rows, 1), 0) + i * block_rows
    is_pos = row < sample_num
    valid = row < n_rows                            # mask padded tail rows

    # 2-class cross entropy: logsumexp([sp, sn]) - correct = softplus(other - correct)
    d = jnp.where(is_pos, sim_neg - sim_pos, sim_pos - sim_neg)
    per_row = jnp.maximum(d, 0.0) + jnp.log1p(jnp.exp(-jnp.abs(d)))   # stable softplus
    per_row = jnp.where(valid, per_row, 0.0)

    # pure VPU accumulate; defer the cross-sublane reduce to the last step
    acc_ref[...] += per_row

    @pl.when(i == pl.num_programs(0) - 1)
    def _():
        total = jnp.sum(acc_ref[...], axis=0, keepdims=True)          # (1, 1)
        o_ref[...] = total / n_rows


def _contrastive_head(feats, protos2, sample_num, block_rows):
    """feats: (2*sample_num, C) gathered rows; protos2: (2, C). Returns scalar loss."""
    R, C = feats.shape
    Cp = pl.cdiv(C, LANES) * LANES
    bs = max(8, min(block_rows, pl.cdiv(R, 8) * 8))
    Rp = pl.cdiv(R, bs) * bs

    f = feats
    if Cp != C or Rp != R:
        f = jnp.pad(f, ((0, Rp - R), (0, Cp - C)))
    p = jnp.pad(protos2, ((0, 8 - protos2.shape[0]), (0, Cp - C)))    # (8, Cp)

    kernel = functools.partial(
        _contrastive_head_kernel,
        sample_num=sample_num, n_rows=R, block_rows=bs)

    out = pl.pallas_call(
        kernel,
        out_shape=jax.ShapeDtypeStruct((1, 1), jnp.float32),
        grid_spec=pltpu.PrefetchScalarGridSpec(
            num_scalar_prefetch=0,
            grid=(Rp // bs,),
            in_specs=[
                pl.BlockSpec((bs, Cp), lambda i: (i, 0)),
                pl.BlockSpec((8, Cp), lambda i: (0, 0)),
            ],
            out_specs=pl.BlockSpec((1, 1), lambda i: (0, 0)),
            scratch_shapes=[pltpu.VMEM((bs, 1), jnp.float32)],
        ),
        compiler_params=pltpu.CompilerParams(
            dimension_semantics=("arbitrary",),
        ),
    )(f, p)
    return out[0, 0]


def _multinomial_without_replacement(key, weights, num_samples):
    # Gumbel-top-k: equivalent in distribution to
    # torch.multinomial(weights, num_samples, replacement=False).
    logw = jnp.where(weights > 0,
                     jnp.log(jnp.where(weights > 0, weights, 1.0)),
                     -jnp.inf)
    g = jax.random.gumbel(key, weights.shape, dtype=jnp.float32)
    _, idx = jax.lax.top_k(logw + g, num_samples)
    return idx


def _featsample(key, feats, logits, mask, sample_num):
    # TODO(synk): torch's try/except fallback in inclass_sample() (shrinking the
    # sample count when there are too few nonzero weights) is data-dependent in
    # shape and has no static-shape JAX equivalent; we assume enough candidates.
    m = mask.reshape(-1).astype(jnp.float32)
    l = logits.reshape(-1).astype(jnp.float32)
    w = jnp.abs(m - l) ** 3
    pos_w = w * m
    neg_w = w * (1.0 - m)
    k_pos, k_neg = jax.random.split(key)
    neg_idx = _multinomial_without_replacement(k_neg, neg_w, sample_num)
    pos_idx = _multinomial_without_replacement(k_pos, pos_w, sample_num)
    return feats[pos_idx], feats[neg_idx]


@functools.partial(jax.jit, static_argnames=("sample_num", "block_rows"))
def contrastive_loss(inputs, logits, protos, mask, key,
                     sample_num=256, block_rows=256):
    """inputs: (N, C); logits/mask: (N, 1); protos: (proto_pos, proto_neg) each (C, 1)."""
    pos_feats, neg_feats = _featsample(key, inputs, logits, mask, sample_num)
    feats = jnp.concatenate([pos_feats, neg_feats], axis=0)           # (2*sample_num, C)
    proto_pos, proto_neg = protos
    protos2 = jnp.stack([proto_pos.reshape(-1), proto_neg.reshape(-1)], axis=0)
    return _contrastive_head(feats, protos2, sample_num, block_rows)


if __name__ == "__main__":
    key = jax.random.PRNGKey(0)
    k_in, k_logit, k_mask, k_p0, k_p1, k_sample = jax.random.split(key, 6)

    N, C = 512, 32
    sample_num = 64

    inputs = jax.random.normal(k_in, (N, C), dtype=jnp.float32)
    logits = jax.random.uniform(k_logit, (N, 1), dtype=jnp.float32)
    mask = (jax.random.uniform(k_mask, (N, 1)) > 0.5).astype(jnp.float32)
    proto_pos = jax.random.normal(k_p0, (C, 1), dtype=jnp.float32)
    proto_neg = jax.random.normal(k_p1, (C, 1), dtype=jnp.float32)

    loss = contrastive_loss(inputs, logits, (proto_pos, proto_neg), mask,
                            k_sample, sample_num=sample_num)
    jax.block_until_ready(loss)

    # ---- pure-JAX reference using the exact same sampled indices ----
    pos_feats, neg_feats = _featsample(k_sample, inputs, logits, mask, sample_num)
    feats = jnp.concatenate([pos_feats, neg_feats], axis=0).astype(jnp.float32)
    protos2 = jnp.stack([proto_pos.reshape(-1), proto_neg.reshape(-1)], axis=0)
    fn = jnp.maximum(jnp.linalg.norm(feats, axis=-1, keepdims=True), 1e-8)
    pn = jnp.maximum(jnp.linalg.norm(protos2, axis=-1, keepdims=True), 1e-8)
    sims = (feats @ protos2.T) / (fn * pn.T)                          # (2S, 2)
    labels = jnp.concatenate([jnp.zeros((sample_num,), jnp.int32),
                              jnp.ones((sample_num,), jnp.int32)])
    logz = jax.scipy.special.logsumexp(sims, axis=-1)
    correct = jnp.take_along_axis(sims, labels[:, None], axis=-1)[:, 0]
    ref = jnp.mean(logz - correct)

    assert jnp.allclose(loss, ref, rtol=1e-5, atol=1e-5), (loss, ref)
    print("KERNEL_OK")
</pallas_src>

<mosaic_0001>
module attributes {stable_mosaic.version = 11 : i64} {
  func.func @_contrastive_head_kernel(%arg0: i32, %arg1: memref<128x128xf32, #tpu.memory_space<vmem>>, %arg2: memref<8x128xf32, #tpu.memory_space<vmem>>, %arg3: memref<1x1xf32, #tpu.memory_space<vmem>>, %arg4: memref<128x1xf32, #tpu.memory_space<vmem>>) attributes {dimension_semantics = [#tpu.dimension_semantics<arbitrary>], iteration_bounds = array<i64: 1>, scalar_prefetch = 0 : i64, scratch_operands = 1 : i64, tpu.core_type = #tpu.core_type<tc>, window_params = [{transform_indices = @transform_0, window_bounds = array<i64: 128, 128>}, {pipeline_mode = #tpu.pipeline_mode<synchronous>, transform_indices = @transform_1, window_bounds = array<i64: 8, 128>}, {pipeline_mode = #tpu.pipeline_mode<synchronous>, transform_indices = @transform_2, window_bounds = array<i64: 1, 1>}]} {
    %c0_i32 = arith.constant 0 : i32
    %0 = arith.cmpi eq, %arg0, %c0_i32 : i32
    %1 = arith.extui %0 : i1 to i32
    %c0_i32_0 = arith.constant 0 : i32
    %2 = arith.cmpi ne, %1, %c0_i32_0 : i32
    scf.if %2 {
      %cst_21 = arith.constant 0.000000e+00 : f32
      %66 = vector.broadcast %cst_21 : f32 to vector<128x1xf32>
      %c0_22 = arith.constant 0 : index
      %c0_23 = arith.constant 0 : index
      %67 = vector.load %arg4[%c0_22, %c0_23] : memref<128x1xf32, #tpu.memory_space<vmem>>, vector<128x1xf32>
      tpu.vector_store %arg4[%c0_22, %c0_23], %66 {strides = array<i32>} : memref<128x1xf32, #tpu.memory_space<vmem>>, vector<128x1xf32>,
    } else {
    }
    %c0 = arith.constant 0 : index
    %c0_1 = arith.constant 0 : index
    %3 = vector.load %arg1[%c0, %c0_1] : memref<128x128xf32, #tpu.memory_space<vmem>>, vector<128x128xf32>
    %c0_2 = arith.constant 0 : index
    %c0_3 = arith.constant 0 : index
    %4 = vector.load %arg2[%c0_2, %c0_3] : memref<8x128xf32, #tpu.memory_space<vmem>>, vector<8x128xf32>
    %5 = vector.extract_strided_slice %4 {offsets = [0, 0], sizes = [1, 128], strides = [1, 1]} : vector<8x128xf32> to vector<1x128xf32>
    %6 = vector.extract_strided_slice %4 {offsets = [1, 0], sizes = [1, 128], strides = [1, 1]} : vector<8x128xf32> to vector<1x128xf32>
    %7 = arith.mulf %3, %3 : vector<128x128xf32>
    %cst = arith.constant dense<0.000000e+00> : vector<128xf32>
    %8 = vector.multi_reduction <add>, %7, %cst [1] : vector<128x128xf32> to vector<128xf32>
    %9 = vector.shape_cast %8 : vector<128xf32> to vector<128x1xf32>
    %10 = math.sqrt %9 : vector<128x1xf32>
    %cst_4 = arith.constant 9.99999993E-9 : f32
    %11 = vector.broadcast %cst_4 : f32 to vector<128x1xf32>
    %12 = arith.maximumf %10, %11 : vector<128x1xf32>
    %13 = arith.mulf %5, %5 : vector<1x128xf32>
    %cst_5 = arith.constant dense<0.000000e+00> : vector<1xf32>
    %14 = vector.multi_reduction <add>, %13, %cst_5 [1] : vector<1x128xf32> to vector<1xf32>
    %15 = vector.shape_cast %14 : vector<1xf32> to vector<1x1xf32>
    %16 = math.sqrt %15 : vector<1x1xf32>
    %cst_6 = arith.constant 9.99999993E-9 : f32
    %17 = vector.broadcast %cst_6 : f32 to vector<1x1xf32>
    %18 = arith.maximumf %16, %17 : vector<1x1xf32>
    %19 = arith.mulf %6, %6 : vector<1x128xf32>
    %cst_7 = arith.constant dense<0.000000e+00> : vector<1xf32>
    %20 = vector.multi_reduction <add>, %19, %cst_7 [1] : vector<1x128xf32> to vector<1xf32>
    %21 = vector.shape_cast %20 : vector<1xf32> to vector<1x1xf32>
    %22 = math.sqrt %21 : vector<1x1xf32>
    %cst_8 = arith.constant 9.99999993E-9 : f32
    %23 = vector.broadcast %cst_8 : f32 to vector<1x1xf32>
    %24 = arith.maximumf %22, %23 : vector<1x1xf32>
    %25 = vector.broadcast %5 : vector<1x128xf32> to vector<128x128xf32>
    %26 = arith.mulf %3, %25 : vector<128x128xf32>
    %cst_9 = arith.constant dense<0.000000e+00> : vector<128xf32>
    %27 = vector.multi_reduction <add>, %26, %cst_9 [1] : vector<128x128xf32> to vector<128xf32>
    %28 = vector.shape_cast %27 : vector<128xf32> to vector<128x1xf32>
    %29 = vector.broadcast %6 : vector<1x128xf32> to vector<128x128xf32>
    %30 = arith.mulf %3, %29 : vector<128x128xf32>
    %cst_10 = arith.constant dense<0.000000e+00> : vector<128xf32>
    %31 = vector.multi_reduction <add>, %30, %cst_10 [1] : vector<128x128xf32> to vector<128xf32>
    %32 = vector.shape_cast %31 : vector<128xf32> to vector<128x1xf32>
    %33 = vector.broadcast %18 : vector<1x1xf32> to vector<128x1xf32>
    %34 = arith.mulf %12, %33 : vector<128x1xf32>
    %35 = arith.divf %28, %34 : vector<128x1xf32>
    %36 = vector.broadcast %24 : vector<1x1xf32> to vector<128x1xf32>
    %37 = arith.mulf %12, %36 : vector<128x1xf32>
    %38 = arith.divf %32, %37 : vector<128x1xf32>
    %39 = tpu.iota {dimensions = array<i32: 0>} : vector<128x1xi32>
    %c128_i32 = arith.constant 128 : i32
    %40 = arith.muli %arg0, %c128_i32 : i32
    %41 = vector.broadcast %40 : i32 to vector<128x1xi32>
    %42 = arith.addi %39, %41 : vector<128x1xi32>
    %c64_i32 = arith.constant 64 : i32
    %43 = vector.broadcast %c64_i32 : i32 to vector<128x1xi32>
    %44 = arith.cmpi slt, %42, %43 : vector<128x1xi32>
    %c128_i32_11 = arith.constant 128 : i32
    %45 = vector.broadcast %c128_i32_11 : i32 to vector<128x1xi32>
    %46 = arith.cmpi slt, %42, %45 : vector<128x1xi32>
    %47 = arith.subf %38, %35 : vector<128x1xf32>
    %48 = arith.subf %35, %38 : vector<128x1xf32>
    %49 = arith.select %44, %47, %48 : vector<128x1xi1>, vector<128x1xf32>
    %cst_12 = arith.constant 0.000000e+00 : f32
    %50 = vector.broadcast %cst_12 : f32 to vector<128x1xf32>
    %51 = arith.maximumf %49, %50 : vector<128x1xf32>
    %52 = math.absf %49 : vector<128x1xf32>
    %cst_13 = arith.constant 0.000000e+00 : f32
    %53 = vector.broadcast %cst_13 : f32 to vector<128x1xf32>
    %54 = arith.subf %53, %52 : vector<128x1xf32>
    %55 = math.exp %54 : vector<128x1xf32>
    %56 = math.log1p %55 : vector<128x1xf32>
    %57 = arith.addf %51, %56 : vector<128x1xf32>
    %cst_14 = arith.constant 0.000000e+00 : f32
    %58 = vector.broadcast %cst_14 : f32 to vector<128x1xf32>
    %59 = arith.select %46, %57, %58 : vector<128x1xi1>, vector<128x1xf32>
    %c0_15 = arith.constant 0 : index
    %c0_16 = arith.constant 0 : index
    %60 = vector.load %arg4[%c0_15, %c0_16] : memref<128x1xf32, #tpu.memory_space<vmem>>, vector<128x1xf32>
    %61 = arith.addf %60, %59 : vector<128x1xf32>
    %c0_17 = arith.constant 0 : index
    %c0_18 = arith.constant 0 : index
    %62 = vector.load %arg4[%c0_17, %c0_18] : memref<128x1xf32, #tpu.memory_space<vmem>>, vector<128x1xf32>
    tpu.vector_store %arg4[%c0_17, %c0_18], %61 {strides = array<i32>} : memref<128x1xf32, #tpu.memory_space<vmem>>, vector<128x1xf32>,
    %c0_i32_19 = arith.constant 0 : i32
    %63 = arith.cmpi eq, %arg0, %c0_i32_19 : i32
    %64 = arith.extui %63 : i1 to i32
    %c0_i32_20 = arith.constant 0 : i32
    %65 = arith.cmpi ne, %64, %c0_i32_20 : i32
    scf.if %65 {
      %c0_21 = arith.constant 0 : index
      %c0_22 = arith.constant 0 : index
      %66 = vector.load %arg4[%c0_21, %c0_22] : memref<128x1xf32, #tpu.memory_space<vmem>>, vector<128x1xf32>
      %cst_23 = arith.constant dense<0.000000e+00> : vector<1xf32>
      %67 = vector.multi_reduction <add>, %66, %cst_23 [0] : vector<128x1xf32> to vector<1xf32>
      %68 = vector.shape_cast %67 : vector<1xf32> to vector<1x1xf32>
      %cst_24 = arith.constant 1.280000e+02 : f32
      %69 = vector.broadcast %cst_24 : f32 to vector<1x1xf32>
      %70 = arith.divf %68, %69 : vector<1x1xf32>
      %c0_25 = arith.constant 0 : index
      %c0_26 = arith.constant 0 : index
      %71 = vector.load %arg3[%c0_25, %c0_26] : memref<1x1xf32, #tpu.memory_space<vmem>>, vector<1x1xf32>
      tpu.vector_store %arg3[%c0_25, %c0_26], %70 {strides = array<i32>} : memref<1x1xf32, #tpu.memory_space<vmem>>, vector<1x1xf32>,
    } else {
    }
    return
  }
  func.func @transform_0(%arg0: i32) -> (i32, i32) {
    %c0_i32 = arith.constant 0 : i32
    %c0_i32_0 = arith.constant 0 : i32
    return %arg0, %c0_i32 : i32, i32
  }
  func.func @transform_1(%arg0: i32) -> (i32, i32) {
    %c0_i32 = arith.constant 0 : i32
    %c0_i32_0 = arith.constant 0 : i32
    %c0_i32_1 = arith.constant 0 : i32
    return %c0_i32, %c0_i32_0 : i32, i32
  }
  func.func @transform_2(%arg0: i32) -> (i32, i32) {
    %c0_i32 = arith.constant 0 : i32
    %c0_i32_0 = arith.constant 0 : i32
    %c0_i32_1 = arith.constant 0 : i32
    return %c0_i32, %c0_i32_0 : i32, i32
  }
}

</mosaic_0001>

<bundles_post_ra>
// kernel: contrastive_loss.1
= control target key start
LH: loop header
LB: loop body
LE: loop exit
PB: predicated region body
PF: predicated region fallthrough
CT: control target
= control target key end

     0   :  { %vm227_vm0 = vcmask 1040384   ;;  %vm239_vm1 = vcmask 1041409   ;;  %s1872_s0 = inlined_call_operand.vmem [shape: f32[128,128], index: 0, kind: input, shape index: {}]   ;;  %s1873_s1 = inlined_call_operand.vmem [shape: f32[8,128], index: 1, kind: input, shape index: {}]   ;;  %s1874_s2 = inlined_call_operand.hbm [shape: f32[1,1], index: 2, kind: output, shape index: {}]  }
   0x1   :  { %v1163_v0 = vld [vmem:[%s1872_s0] sm:$0xff]  ;;  %v1171_v2 = vld [vmem:[%s1872_s0 + $0x8] sm:$0xff]  ;;  %v1180_v7 = vld [vmem:[%s1872_s0 + $0x18] sm:$0xff] }
   0x2   :  { %v49_v1 = vld [vmem:[%s1873_s1] sm:$0xff]  ;;  %v50_v3 = vmul.f32 %v1163_v0, %v1163_v0  ;;  %v51_v6 = vmul.f32 %v1171_v2, %v1171_v2  ;;  %v35_v9 = vld [vmem:[%s1872_s0 + $0x10] sm:$0xff] }
   0x3   :  { %v226_v4 = vmul.f32 %v49_v1, %v49_v1 }
   0x4   :  { %66 = vadd.xlane.f32.xlu1 %v50_v3 }
   0x5   :  { %v228_v5 = vsel %vm227_vm0, %v226_v4, 0.0  ;;  %v240_v8 = vsel %vm239_vm1, %v226_v4, 0.0 }
   0x6   :  { %229 = vadd.xlane.f32.xlu0 %v228_v5 }
   0x7   :  { %7 = vsyncpa [#allocation4], 0  ;;  %v53_v10 = vmul.f32 %v1180_v7, %v1180_v7  ;;  %v52_v11 = vmul.f32 %v35_v9, %v35_v9  ;;  %v1190_v12 = vld [vmem:[%s1872_s0 + $0x28] sm:$0xff]  ;;  %v37_v13 = vld [vmem:[%s1872_s0 + $0x20] sm:$0xff]  ;;  %v251_v22 = vlaneseq  ;;  %vm16_vm2 = vcmask 7168  }
   0x8   :  { %68 = vadd.xlane.f32.xlu1 %v51_v6  ;;  %v55_v14 = vmul.f32 %v1190_v12, %v1190_v12  ;;  %v54_v15 = vmul.f32 %v37_v13, %v37_v13  ;;  %v1200_v16 = vld [vmem:[%s1872_s0 + $0x38] sm:$0xff]  ;;  %v39_v17 = vld [vmem:[%s1872_s0 + $0x30] sm:$0xff]  ;;  %v1210_v20 = vld [vmem:[%s1872_s0 + $0x48] sm:$0xff]  ;;  %v1143_v58 = vmov 0.0  }
   0x9   :  { %v57_v18 = vmul.f32 %v1200_v16, %v1200_v16  ;;  %v56_v19 = vmul.f32 %v39_v17, %v39_v17  ;;  %v1215_v21 = vld [vmem:[%s1872_s0 + $0x40] sm:$0xff]  ;;  %v59_v23 = vmul.f32 %v1210_v20, %v1210_v20  ;;  %v1224_v25 = vld [vmem:[%s1872_s0 + $0x58] sm:$0xff]  ;;  %v1229_v26 = vld [vmem:[%s1872_s0 + $0x50] sm:$0xff]  ;;  %v1231_v27 = vshrl.u32 %v251_v22, 7  ;;  %18 = vst.msk [vmem:[#allocation2 + $0x8] sm:$0xff] %vm16_vm2, %v1143_v58 }
   0xa   :  { %241 = vadd.xlane.f32.xlu0 %v240_v8  ;;  %v58_v24 = vmul.f32 %v1215_v21, %v1215_v21  ;;  %v61_v28 = vmul.f32 %v1224_v25, %v1224_v25  ;;  %v60_v29 = vmul.f32 %v1229_v26, %v1229_v26  ;;  %v1240_v30 = vld [vmem:[%s1872_s0 + $0x68] sm:$0xff]  ;;  %v1245_v31 = vld [vmem:[%s1872_s0 + $0x60] sm:$0xff]  ;;  %v1255_v35 = vld [vmem:[%s1872_s0 + $0x78] sm:$0xff]  ;;  %17 = vst.msk [vmem:[#allocation2] sm:$0xff] %vm16_vm2, %v1143_v58 }
   0xb   :  { %v253_v32 = vsub.s32 0, %v1231_v27  ;;  %v63_v33 = vmul.f32 %v1240_v30, %v1240_v30  ;;  %v62_v34 = vmul.f32 %v1245_v31, %v1245_v31  ;;  %v1260_v36 = vld [vmem:[%s1872_s0 + $0x70] sm:$0xff]  ;;  %v305_v38 = vsub.s32 1, %v1231_v27  ;;  %19 = vst.msk [vmem:[#allocation2 + $0x10] sm:$0xff] %vm16_vm2, %v1143_v58  ;;  %20 = vst.msk [vmem:[#allocation2 + $0x18] sm:$0xff] %vm16_vm2, %v1143_v58  ;;  %s1144_s0 = smov [#allocation3]  }
   0xc   :  { %72 = vadd.xlane.f32.xlu1 %v53_v10  ;;  %v65_v39 = vmul.f32 %v1255_v35, %v1255_v35  ;;  %v64_v40 = vmul.f32 %v1260_v36, %v1260_v36  ;;  %21 = vst.msk [vmem:[#allocation2 + $0x20] sm:$0xff] %vm16_vm2, %v1143_v58  ;;  %22 = vst.msk [vmem:[#allocation2 + $0x28] sm:$0xff] %vm16_vm2, %v1143_v58  ;;  %s945_s14 = sshll.u32 %s1144_s0, 4  ;;  %s946_s14 = int_to_ptr.vmem [resolvable:$true] %s945_s14 }
   0xd   :  { %v1264_v37 = vrot.slane %v49_v1, %v253_v32  ;;  %v1273_v41 = vrot.slane %v49_v1, %v305_v38  ;;  %23 = vst.msk [vmem:[#allocation2 + $0x30] sm:$0xff] %vm16_vm2, %v1143_v58  ;;  %24 = vst.msk [vmem:[#allocation2 + $0x38] sm:$0xff] %vm16_vm2, %v1143_v58  ;;  %s1119_s15 = scalar_lea.vmem %s946_s14, 16  ;;  %s1123_s16 = scalar_lea.vmem %s946_s14, 32 }
   0xe   :  { %70 = vadd.xlane.f32.xlu0 %v52_v11  ;;  %25 = vst.msk [vmem:[#allocation2 + $0x40] sm:$0xff] %vm16_vm2, %v1143_v58  ;;  %26 = vst.msk [vmem:[#allocation2 + $0x48] sm:$0xff] %vm16_vm2, %v1143_v58  ;;  %p1120_p0 = scmp.ne.s32.totalorder %s946_s14, %s1119_s15  ;;  %p1124_p1 = scmp.lt.s32.totalorder %s946_s14, %s946_s14 }
   0xf   :  { %v256_v42 = vmul.f32 %v1264_v37, %v1171_v2  ;;  %v255_v43 = vmul.f32 %v1264_v37, %v1163_v0  ;;  %v308_v44 = vmul.f32 %v1273_v41, %v1171_v2  ;;  %v307_v45 = vmul.f32 %v1273_v41, %v1163_v0  ;;  %27 = vst.msk [vmem:[#allocation2 + $0x50] sm:$0xff] %vm16_vm2, %v1143_v58  ;;  %p1125_p2 = scmp.lt.s32.totalorder %s1123_s16, %s1119_s15 }
  0x10   :  { %76 = vadd.xlane.f32.xlu1 %v55_v14  ;;  %v309_v46 = vmul.f32 %v1273_v41, %v35_v9  ;;  %v257_v47 = vmul.f32 %v1264_v37, %v35_v9  ;;  %v310_v48 = vmul.f32 %v1273_v41, %v1180_v7  ;;  %v258_v49 = vmul.f32 %v1264_v37, %v1180_v7 }
  0x11   :  { %v311_v50 = vmul.f32 %v1273_v41, %v37_v13  ;;  %v259_v51 = vmul.f32 %v1264_v37, %v37_v13  ;;  %v312_v52 = vmul.f32 %v1273_v41, %v1190_v12  ;;  %v260_v53 = vmul.f32 %v1264_v37, %v1190_v12  ;;  %28 = vst.msk [vmem:[#allocation2 + $0x58] sm:$0xff] %vm16_vm2, %v1143_v58  ;;  %p1126_p3 = por %p1125_p2, %p1124_p1 }
  0x12   :  { %74 = vadd.xlane.f32.xlu0 %v54_v15  ;;  %v313_v54 = vmul.f32 %v1273_v41, %v39_v17  ;;  %v261_v55 = vmul.f32 %v1264_v37, %v39_v17  ;;  %v314_v56 = vmul.f32 %v1273_v41, %v1200_v16  ;;  %v262_v57 = vmul.f32 %v1264_v37, %v1200_v16 }
  0x13   :  { %29 = vst.msk [vmem:[#allocation2 + $0x60] sm:$0xff] %vm16_vm2, %v1143_v58  ;;  %30 = vst.msk [vmem:[#allocation2 + $0x68] sm:$0xff] %vm16_vm2, %v1143_v58  ;;  %v315_v59 = vmul.f32 %v1273_v41, %v1215_v21  ;;  %v263_v60 = vmul.f32 %v1264_v37, %v1215_v21  ;;  %v316_v61 = vmul.f32 %v1273_v41, %v1210_v20  ;;  %p1127_p4 = pnand %p1126_p3, %p1120_p0 }
  0x14   :  { %80 = vadd.xlane.f32.xlu1 %v57_v18  ;;  %31 = vst.msk [vmem:[#allocation2 + $0x70] sm:$0xff] %vm16_vm2, %v1143_v58  ;;  %32 = vst.msk [vmem:[#allocation2 + $0x78] sm:$0xff] %vm16_vm2, %v1143_v58  ;;  %v264_v62 = vmul.f32 %v1264_v37, %v1210_v20  ;;  %v317_v63 = vmul.f32 %v1273_v41, %v1229_v26  ;;  %v265_v0 = vmul.f32 %v1264_v37, %v1229_v26 }
  0x15   :  { %v318_v1 = vmul.f32 %v1273_v41, %v1224_v25  ;;  %v266_v2 = vmul.f32 %v1264_v37, %v1224_v25  ;;  %v319_v3 = vmul.f32 %v1273_v41, %v1245_v31  ;;  %v267_v4 = vmul.f32 %v1264_v37, %v1245_v31 }
  0x16   :  { %78 = vadd.xlane.f32.xlu0 %v56_v19  ;;  %v320_v5 = vmul.f32 %v1273_v41, %v1240_v30  ;;  %v268_v6 = vmul.f32 %v1264_v37, %v1240_v30  ;;  %v321_v7 = vmul.f32 %v1273_v41, %v1260_v36  ;;  %v269_v8 = vmul.f32 %v1264_v37, %v1260_v36 }
  0x17   :  { %v322_v9 = vmul.f32 %v1273_v41, %v1255_v35  ;;  %v270_v10 = vmul.f32 %v1264_v37, %v1255_v35 }
  0x18   :  { %84 = vadd.xlane.f32.xlu1 %v59_v23 }
  0x1a   :  { %82 = vadd.xlane.f32.xlu0 %v58_v24 }
  0x1c   :  { %88 = vadd.xlane.f32.xlu1 %v61_v28 }
  0x1e   :  { %86 = vadd.xlane.f32.xlu0 %v60_v29 }
  0x20   :  { %92 = vadd.xlane.f32.xlu1 %v63_v33 }
  0x22   :  { %90 = vadd.xlane.f32.xlu0 %v62_v34 }
  0x24   :  { %96 = vadd.xlane.f32.xlu1 %v65_v39 }
  0x26   :  { %94 = vadd.xlane.f32.xlu0 %v64_v40 }
  0x28   :  { %273 = vadd.xlane.f32.xlu1 %v256_v42 }
  0x2a   :  { %271 = vadd.xlane.f32.xlu0 %v255_v43 }
  0x2c   :  { %325 = vadd.xlane.f32.xlu1 %v308_v44 }
  0x2e   :  { %323 = vadd.xlane.f32.xlu0 %v307_v45 }
  0x30   :  { %327 = vadd.xlane.f32.xlu1 %v309_v46 }
  0x32   :  { %275 = vadd.xlane.f32.xlu0 %v257_v47 }
  0x34   :  { %329 = vadd.xlane.f32.xlu1 %v310_v48 }
  0x36   :  { %277 = vadd.xlane.f32.xlu0 %v258_v49 }
  0x38   :  { %331 = vadd.xlane.f32.xlu1 %v311_v50 }
  0x3a   :  { %279 = vadd.xlane.f32.xlu0 %v259_v51 }
  0x3c   :  { %333 = vadd.xlane.f32.xlu1 %v312_v52 }
  0x3e   :  { %281 = vadd.xlane.f32.xlu0 %v260_v53 }
  0x40   :  { %335 = vadd.xlane.f32.xlu1 %v313_v54 }
  0x42   :  { %283 = vadd.xlane.f32.xlu0 %v261_v55 }
  0x44   :  { %337 = vadd.xlane.f32.xlu1 %v314_v56 }
  0x46   :  { %285 = vadd.xlane.f32.xlu0 %v262_v57 }
  0x48   :  { %339 = vadd.xlane.f32.xlu1 %v315_v59 }
  0x4a   :  { %287 = vadd.xlane.f32.xlu0 %v263_v60 }
  0x4c   :  { %341 = vadd.xlane.f32.xlu1 %v316_v61 }
  0x4e   :  { %289 = vadd.xlane.f32.xlu0 %v264_v62 }
  0x50   :  { %343 = vadd.xlane.f32.xlu1 %v317_v63 }
  0x52   :  { %291 = vadd.xlane.f32.xlu0 %v265_v0 }
  0x54   :  { %345 = vadd.xlane.f32.xlu1 %v318_v1 }
  0x56   :  { %293 = vadd.xlane.f32.xlu0 %v266_v2 }
  0x58   :  { %347 = vadd.xlane.f32.xlu1 %v319_v3 }
  0x5a   :  { %295 = vadd.xlane.f32.xlu0 %v267_v4 }
  0x5c   :  { %349 = vadd.xlane.f32.xlu1 %v320_v5 }
  0x5e   :  { %297 = vadd.xlane.f32.xlu0 %v268_v6 }
  0x60   :  { %351 = vadd.xlane.f32.xlu1 %v321_v7 }
  0x62   :  { %299 = vadd.xlane.f32.xlu0 %v269_v8 }
  0x64   :  { %353 = vadd.xlane.f32.xlu1 %v322_v9 }
  0x66   :  { %301 = vadd.xlane.f32.xlu0 %v270_v10 }
  0x91   :  { %v67_v11 = vpop.xlane.xlu1 %66 }
  0x92   :  { %vm100_vm3 = vcmp.eq.f32.partialorder %v67_v11, inf  ;;  %vm102_vm4 = vcmp.eq.f32.partialorder %v67_v11, 0.0  ;;  %v103_v28 = vand.u32 2147483648, %v67_v11 }
  0x93   :  { %v230_v12 = vpop.xlane.xlu0 %229 }
  0x94   :  { %955 = vrsqrt.f32 %v230_v12  ;;  %vm233_vm5 = vcmp.eq.f32.partialorder %v230_v12, inf  ;;  %vm235_vm6 = vcmp.eq.f32.partialorder %v230_v12, 0.0  ;;  %v236_v31 = vand.u32 2147483648, %v230_v12 }
  0x95   :  { %957 = vrsqrt.f32 %v67_v11  ;;  %v1349_v13 = vpop.xlane.xlu1 %68 }
  0x96   :  { %959 = vrsqrt.f32 %v1349_v13  ;;  %vm107_vm7 = vcmp.eq.f32.partialorder %v1349_v13, inf  ;;  %vm109_vm8 = vcmp.eq.f32.partialorder %v1349_v13, 0.0  ;;  %v110_v35 = vand.u32 2147483648, %v1349_v13 }
  0x97   :  { %v242_v14 = vpop.xlane.xlu0 %241 }
  0x98   :  { %961 = vrsqrt.f32 %v242_v14  ;;  %vm245_vm9 = vcmp.eq.f32.partialorder %v242_v14, inf  ;;  %vm247_vm10 = vcmp.eq.f32.partialorder %v242_v14, 0.0  ;;  %v248_v40 = vand.u32 2147483648, %v242_v14 }
  0x99   :  { %v1352_v15 = vpop.xlane.xlu1 %72 }
  0x9a   :  { %963 = vrsqrt.f32 %v1352_v15  ;;  %vm121_vm11 = vcmp.eq.f32.partialorder %v1352_v15, inf  ;;  %v124_v44 = vand.u32 2147483648, %v1352_v15  ;;  %vm123_vm13 = vcmp.eq.f32.partialorder %v1352_v15, 0.0 }
  0x9b   :  { %v1354_v16 = vpop.xlane.xlu0 %70 }
  0x9c   :  { %965 = vrsqrt.f32 %v1354_v16  ;;  %vm114_vm12 = vcmp.eq.f32.partialorder %v1354_v16, inf  ;;  %vm116_vm14 = vcmp.eq.f32.partialorder %v1354_v16, 0.0  ;;  %v117_v48 = vand.u32 2147483648, %v1354_v16 }
  0x9d   :  { %v1358_v18 = vpop.xlane.xlu1 %76 }
  0x9e   :  { %v956_v17 = vpop.eup %955  ;;  %967 = vrsqrt.f32 %v1358_v18  ;;  %vm135_vm15 = vcmp.eq.f32.partialorder %v1358_v18, inf  ;;  %v138_v52 = vand.u32 2147483648, %v1358_v18  ;;  %vm137_vm1 = vcmp.eq.f32.partialorder %v1358_v18, 0.0 }
  0x9f   :  { %v958_v19 = vpop.eup %957  ;;  %v1361_v20 = vpop.xlane.xlu0 %74  ;;  %v232_v21 = vmul.f32 %v956_v17, %v230_v12 }
  0xa0   :  { %969 = vrsqrt.f32 %v1361_v20  ;;  %v960_v22 = vpop.eup %959  ;;  %v99_v24 = vmul.f32 %v958_v19, %v67_v11  ;;  %vm128_vm0 = vcmp.eq.f32.partialorder %v1361_v20, inf  ;;  %v131_v56 = vand.u32 2147483648, %v1361_v20 }
  0xa1   :  { %v1364_v25 = vpop.xlane.xlu1 %80  ;;  %v234_v29 = vsel %vm233_vm5, %v230_v12, %v232_v21  ;;  %v106_v33 = vmul.f32 %v960_v22, %v1349_v13 }
  0xa2   :  { %v962_v23 = vpop.eup %961  ;;  %971 = vrsqrt.f32 %v1364_v25  ;;  %v101_v34 = vsel %vm100_vm3, %v67_v11, %v99_v24  ;;  %v237_v39 = vsel %vm235_vm6, %v236_v31, %v234_v29  ;;  %vm130_vm3 = vcmp.eq.f32.partialorder %v1361_v20, 0.0 }
  0xa3   :  { %v1367_v26 = vpop.xlane.xlu0 %78  ;;  %v244_v30 = vmul.f32 %v962_v23, %v242_v14  ;;  %v1383_v46 = vsel %vm102_vm4, %v103_v28, %v101_v34  ;;  %v108_v47 = vsel %vm107_vm7, %v1349_v13, %v106_v33  ;;  %v238_v50 = vmax.f32 %v237_v39, 1e-08 }
  0xa4   :  { %973 = vrsqrt.f32 %v1367_v26  ;;  %v964_v37 = vpop.eup %963  ;;  %v111_v58 = vsel %vm109_vm8, %v110_v35, %v108_v47  ;;  %vm149_vm4 = vcmp.eq.f32.partialorder %v1364_v25, inf  ;;  %v210_v59 = vmax.f32 %v1383_v46, 1e-08 }
  0xa5   :  { %v1374_v36 = vpop.xlane.xlu1 %84  ;;  %v246_v43 = vsel %vm245_vm9, %v242_v14, %v244_v30  ;;  %v120_v51 = vmul.f32 %v964_v37, %v1352_v15  ;;  %vm151_vm5 = vcmp.eq.f32.partialorder %v1364_v25, 0.0  ;;  %v152_v63 = vand.u32 2147483648, %v1364_v25 }
  0xa6   :  { %v966_v42 = vpop.eup %965  ;;  %975 = vrsqrt.f32 %v1374_v36  ;;  %v249_v54 = vsel %vm247_vm10, %v248_v40, %v246_v43  ;;  %v1417_v1 = vrot.slane %v238_v50, %v253_v32  ;;  %vm142_vm6 = vcmp.eq.f32.partialorder %v1367_v26, inf }
  0xa7   :  { %v1377_v41 = vpop.xlane.xlu0 %82  ;;  %v113_v55 = vmul.f32 %v966_v42, %v1354_v16  ;;  %v250_v2 = vmax.f32 %v249_v54, 1e-08  ;;  %v122_v3 = vsel %vm121_vm11, %v1352_v15, %v120_v51  ;;  %v211_v32 = vmax.f32 %v111_v58, 1e-08 }
  0xa8   :  { %v968_v45 = vpop.eup %967  ;;  %977 = vrsqrt.f32 %v1377_v41  ;;  %vm144_vm7 = vcmp.eq.f32.partialorder %v1367_v26, 0.0  ;;  %v145_v8 = vand.u32 2147483648, %v1367_v26  ;;  %vm163_vm8 = vcmp.eq.f32.partialorder %v1374_v36, inf }
  0xa9   :  { %v1395_v53 = vpop.xlane.xlu1 %88  ;;  %v134_v61 = vmul.f32 %v968_v45, %v1358_v18  ;;  %v115_v5 = vsel %vm114_vm12, %v1354_v16, %v113_v55  ;;  %v166_v9 = vand.u32 2147483648, %v1374_v36  ;;  %v1446_v14 = vrot.slane %v250_v2, %v305_v38 }
  0xaa   :  { %v970_v49 = vpop.eup %969  ;;  %979 = vrsqrt.f32 %v1395_v53  ;;  %v125_v17 = vsel %vm123_vm13, %v124_v44, %v122_v3  ;;  %v118_v19 = vsel %vm116_vm14, %v117_v48, %v115_v5  ;;  %v359_v22 = vmul.f32 %v1417_v1, %v210_v59 }
  0xab   :  { %v1403_v57 = vpop.xlane.xlu0 %86  ;;  %v127_v62 = vmul.f32 %v970_v49, %v1361_v20  ;;  %v136_v10 = vsel %vm135_vm15, %v1358_v18, %v134_v61  ;;  %v159_v24 = vand.u32 2147483648, %v1377_v41  ;;  %v180_v27 = vand.u32 2147483648, %v1395_v53 }
  0xac   :  { %v972_v60 = vpop.eup %971  ;;  %981 = vrsqrt.f32 %v1403_v57  ;;  %v360_v15 = vmul.f32 %v1417_v1, %v211_v32  ;;  %v1465_v16 = vsel %vm137_vm1, %v138_v52, %v136_v10  ;;  %vm165_vm9 = vcmp.eq.f32.partialorder %v1374_v36, 0.0 }
  0xad   :  { %v1423_v4 = vpop.xlane.xlu1 %92  ;;  %v148_v6 = vmul.f32 %v972_v60, %v1364_v25  ;;  %v129_v11 = vsel %vm128_vm0, %v1361_v20, %v127_v62  ;;  %vm156_vm10 = vcmp.eq.f32.partialorder %v1377_v41, inf  ;;  %v173_v29 = vand.u32 2147483648, %v1403_v57 }
  0xae   :  { %v974_v0 = vpop.eup %973  ;;  %983 = vrsqrt.f32 %v1423_v4  ;;  %v132_v28 = vsel %vm130_vm3, %v131_v56, %v129_v11  ;;  %vm177_vm11 = vcmp.eq.f32.partialorder %v1395_v53, inf  ;;  %vm170_vm12 = vcmp.eq.f32.partialorder %v1403_v57, inf }
  0xaf   :  { %v1430_v7 = vpop.xlane.xlu0 %90  ;;  %v141_v12 = vmul.f32 %v974_v0, %v1367_v26  ;;  %v150_v23 = vsel %vm149_vm4, %v1364_v25, %v148_v6  ;;  %v194_v20 = vand.u32 2147483648, %v1423_v4  ;;  %vm191_vm13 = vcmp.eq.f32.partialorder %v1423_v4, inf }
  0xb0   :  { %985 = vrsqrt.f32 %v1430_v7  ;;  %v976_v13 = vpop.eup %975  ;;  %v1483_v34 = vsel %vm151_vm5, %v152_v63, %v150_v23  ;;  %v187_v35 = vand.u32 2147483648, %v1430_v7  ;;  %v412_v39 = vmul.f32 %v1446_v14, %v211_v32 }
  0xb1   :  { %v1452_v21 = vpop.xlane.xlu1 %96  ;;  %v143_v31 = vsel %vm142_vm6, %v1367_v26, %v141_v12  ;;  %v162_v18 = vmul.f32 %v976_v13, %v1374_v36  ;;  %vm158_vm14 = vcmp.eq.f32.partialorder %v1377_v41, 0.0  ;;  %v411_v43 = vmul.f32 %v1446_v14, %v210_v59 }
  0xb2   :  { %987 = vrsqrt.f32 %v1452_v21  ;;  %v978_v30 = vpop.eup %977  ;;  %v212_v25 = vmax.f32 %v118_v19, 1e-08  ;;  %v213_v44 = vmax.f32 %v125_v17, 1e-08  ;;  %v1496_v45 = vsel %vm144_vm7, %v145_v8, %v143_v31 }
  0xb3   :  { %v1460_v38 = vpop.xlane.xlu0 %94  ;;  %v155_v46 = vmul.f32 %v978_v30, %v1377_v41  ;;  %vm179_vm15 = vcmp.eq.f32.partialorder %v1395_v53, 0.0  ;;  %vm172_vm0 = vcmp.eq.f32.partialorder %v1403_v57, 0.0  ;;  %v214_v47 = vmax.f32 %v132_v28, 1e-08 }
  0xb4   :  { %989 = vrsqrt.f32 %v1460_v38  ;;  %v980_v33 = vpop.eup %979  ;;  %v164_v49 = vsel %vm163_vm8, %v1374_v36, %v162_v18  ;;  %vm193_vm1 = vcmp.eq.f32.partialorder %v1423_v4, 0.0  ;;  %v413_v26 = vmul.f32 %v1446_v14, %v212_v25 }
  0xb5   :  { %v1487_v37 = vpop.xlane.xlu1 %273  ;;  %991 = vrcp.f32 %v359_v22  ;;  %v215_v50 = vmax.f32 %v1465_v16, 1e-08  ;;  %v176_v51 = vmul.f32 %v980_v33, %v1395_v53  ;;  %vm184_vm3 = vcmp.eq.f32.partialorder %v1430_v7, inf }
  0xb6   :  { %v982_v40 = vpop.eup %981  ;;  %993 = vrcp.f32 %v360_v15  ;;  %v361_v55 = vmul.f32 %v1417_v1, %v212_v25  ;;  %v414_v56 = vmul.f32 %v1446_v14, %v213_v44  ;;  %v362_v61 = vmul.f32 %v1417_v1, %v213_v44 }
  0xb7   :  { %v1491_v42 = vpop.xlane.xlu0 %271  ;;  %995 = vrcp.f32 %v412_v39  ;;  %v169_v52 = vmul.f32 %v982_v40, %v1403_v57  ;;  %v415_v62 = vmul.f32 %v1446_v14, %v214_v47  ;;  %vm205_vm4 = vcmp.eq.f32.partialorder %v1452_v21, inf }
  0xb8   :  { %v984_v48 = vpop.eup %983  ;;  %997 = vrcp.f32 %v411_v43  ;;  %v208_v63 = vand.u32 2147483648, %v1452_v21  ;;  %v363_v0 = vmul.f32 %v1417_v1, %v214_v47  ;;  %v1522_v2 = vsel %vm165_vm9, %v166_v9, %v164_v49 }
  0xb9   :  { %v326_v54 = vpop.xlane.xlu1 %325  ;;  %v190_v59 = vmul.f32 %v984_v48, %v1423_v4  ;;  %999 = vrcp.f32 %v413_v26  ;;  %v157_v3 = vsel %vm156_vm10, %v1377_v41, %v155_v46  ;;  %vm198_vm5 = vcmp.eq.f32.partialorder %v1460_v38, inf }
  0xba   :  { %v986_v58 = vpop.eup %985  ;;  %1001 = vrcp.f32 %v361_v55  ;;  %v416_v5 = vmul.f32 %v1446_v14, %v215_v50  ;;  %v178_v32 = vsel %vm177_vm11, %v1395_v53, %v176_v51  ;;  %v171_v36 = vsel %vm170_vm12, %v1403_v57, %v169_v52 }
  0xbb   :  { %v324_v60 = vpop.xlane.xlu0 %323  ;;  %1003 = vrcp.f32 %v414_v56  ;;  %v183_v8 = vmul.f32 %v986_v58, %v1430_v7  ;;  %vm186_vm6 = vcmp.eq.f32.partialorder %v1430_v7, 0.0  ;;  %v192_v11 = vsel %vm191_vm13, %v1423_v4, %v190_v59 }
  0xbc   :  { %v988_v6 = vpop.eup %987  ;;  %1005 = vrcp.f32 %v362_v61  ;;  %vm207_vm7 = vcmp.eq.f32.partialorder %v1452_v21, 0.0  ;;  %v364_v13 = vmul.f32 %v1417_v1, %v215_v50  ;;  %v216_v17 = vmax.f32 %v1496_v45, 1e-08 }
  0xbd   :  { %v328_v9 = vpop.xlane.xlu1 %327  ;;  %1007 = vrcp.f32 %v415_v62  ;;  %v1547_v22 = vsel %vm158_vm14, %v159_v24, %v157_v3  ;;  %vm200_vm8 = vcmp.eq.f32.partialorder %v1460_v38, 0.0  ;;  %v201_v23 = vand.u32 2147483648, %v1460_v38 }
  0xbe   :  { %v990_v10 = vpop.eup %989  ;;  %1009 = vrcp.f32 %v363_v0  ;;  %v217_v15 = vmax.f32 %v1483_v34, 1e-08  ;;  %v1556_v28 = vsel %vm179_vm15, %v180_v27, %v178_v32  ;;  %v1562_v41 = vsel %vm172_vm0, %v173_v29, %v171_v36 }
  0xbf   :  { %v276_v12 = vpop.xlane.xlu0 %275  ;;  %v992_v19 = vpop.eup %991  ;;  %v204_v24 = vmul.f32 %v988_v6, %v1452_v21  ;;  %1011 = vrcp.f32 %v416_v5  ;;  %v1569_v31 = vsel %vm193_vm1, %v194_v20, %v192_v11  ;;  %v197_v53 = vmul.f32 %v990_v10, %v1460_v38 }
  0xc0   :  { %v994_v16 = vpop.eup %993  ;;  %v417_v18 = vmul.f32 %v1446_v14, %v216_v17  ;;  %v365_v33 = vmul.f32 %v1417_v1, %v216_v17  ;;  %v185_v29 = vsel %vm184_vm3, %v1430_v7, %v183_v8  ;;  %1013 = vrcp.f32 %v364_v13 }
  0xc1   :  { %v996_v30 = vpop.eup %995  ;;  %v330_v27 = vpop.xlane.xlu1 %329  ;;  %v378_v34 = vmul.f32 %v994_v16, %v1487_v37  ;;  %v376_v4 = vmul.f32 %v992_v19, %v1491_v42  ;;  %v418_v43 = vmul.f32 %v1446_v14, %v217_v15  ;;  %v206_v44 = vsel %vm205_vm4, %v1452_v21, %v204_v24 }
  0xc2   :  { %v998_v57 = vpop.eup %997  ;;  %v430_v39 = vmul.f32 %v996_v30, %v326_v54  ;;  %1015 = vrcp.f32 %v417_v18  ;;  %v218_v46 = vmax.f32 %v1547_v22, 1e-08  ;;  %v199_v47 = vsel %vm198_vm5, %v1460_v38, %v197_v53 }
  0xc3   :  { %v278_v40 = vpop.xlane.xlu0 %277  ;;  %v428_v20 = vmul.f32 %v998_v57, %v324_v60  ;;  %v1000_v25 = vpop.eup %999  ;;  %1017 = vrcp.f32 %v365_v33  ;;  %v366_v26 = vmul.f32 %v1417_v1, %v217_v15  ;;  %v1596_v51 = vsel %vm186_vm6, %v187_v35, %v185_v29 }
  0xc4   :  { %v1583_v45 = vsub.f32 %v430_v39, %v378_v34  ;;  %v1002_v37 = vpop.eup %1001  ;;  %v432_v48 = vmul.f32 %v1000_v25, %v328_v9  ;;  %v219_v56 = vmax.f32 %v1522_v2, 1e-08  ;;  %v1604_v59 = vsel %vm207_vm7, %v208_v63, %v206_v44 }
  0xc5   :  { %v1589_v42 = vsub.f32 %v428_v20, %v376_v4  ;;  %v332_v49 = vpop.xlane.xlu1 %331  ;;  %v1004_v50 = vpop.eup %1003  ;;  %v380_v54 = vmul.f32 %v1002_v37, %v276_v12  ;;  %1019 = vrcp.f32 %v418_v43  ;;  %v1609_v35 = vsel %vm200_vm8, %v201_v23, %v199_v47 }
  0xc6   :  { %v591_v52 = vand.u32 2147483647, %v1583_v45  ;;  %v1006_v58 = vpop.eup %1005  ;;  %v434_v61 = vmul.f32 %v1004_v50, %v330_v27  ;;  %1021 = vrcp.f32 %v366_v26  ;;  %v419_v21 = vmul.f32 %v1446_v14, %v218_v46 }
  0xc7   :  { %v280_v55 = vpop.xlane.xlu0 %279  ;;  %v590_v60 = vand.u32 2147483647, %v1589_v42  ;;  %v1008_v7 = vpop.eup %1007  ;;  %v1611_v0 = vsub.f32 %v432_v48, %v380_v54  ;;  %v382_v2 = vmul.f32 %v1006_v58, %v278_v40  ;;  %v367_v10 = vmul.f32 %v1417_v1, %v218_v46 }
  0xc8   :  { %v607_v62 = vsub.f32 0.0, %v591_v52  ;;  %v1010_v3 = vpop.eup %1009  ;;  %v436_v6 = vmul.f32 %v1008_v7, %v332_v49  ;;  %v420_v17 = vmul.f32 %v1446_v14, %v219_v56  ;;  %v368_v15 = vmul.f32 %v1417_v1, %v219_v56 }
  0xc9   :  { %v606_v5 = vsub.f32 0.0, %v590_v60  ;;  %v334_v32 = vpop.xlane.xlu1 %333  ;;  %v1012_v63 = vpop.eup %1011  ;;  %v592_v8 = vand.u32 2147483647, %v1611_v0  ;;  %v1615_v9 = vsub.f32 %v434_v61, %v382_v2  ;;  %v384_v12 = vmul.f32 %v1010_v3, %v280_v55 }
  0xca   :  { %v624_v36 = vmul.f32 1.442695, %v607_v62  ;;  %v438_v13 = vmul.f32 %v1012_v63, %v334_v32  ;;  %v1014_v19 = vpop.eup %1013  ;;  %v220_v27 = vmax.f32 %v1562_v41, 1e-08  ;;  %v575_v20 = vmax.f32 %v1583_v45, 0.0 }
  0xcb   :  { %v282_v38 = vpop.xlane.xlu0 %281  ;;  %v622_v11 = vmul.f32 1.442695, %v606_v5  ;;  %v608_v22 = vsub.f32 0.0, %v592_v8  ;;  %v593_v23 = vand.u32 2147483647, %v1615_v9  ;;  %v1621_v24 = vsub.f32 %v436_v6, %v384_v12 }
  0xcc   :  { %1023 = vpow2.f32 %v624_v36  ;;  %v1016_v16 = vpop.eup %1015  ;;  %v386_v30 = vmul.f32 %v1014_v19, %v282_v38  ;;  %v221_v25 = vmax.f32 %v1556_v28, 1e-08  ;;  %v574_v48 = vmax.f32 %v1589_v42, 0.0 }
  0xcd   :  { %1025 = vpow2.f32 %v622_v11  ;;  %v336_v53 = vpop.xlane.xlu1 %335  ;;  %v1018_v18 = vpop.eup %1017  ;;  %v626_v33 = vmul.f32 1.442695, %v608_v22  ;;  %v609_v57 = vsub.f32 0.0, %v593_v23  ;;  %v594_v39 = vand.u32 2147483647, %v1621_v24 }
  0xce   :  { %v440_v29 = vmul.f32 %v1016_v16, %v336_v53  ;;  %1027 = vrcp.f32 %v419_v21  ;;  %v1625_v40 = vsub.f32 %v438_v13, %v386_v30  ;;  %v421_v50 = vmul.f32 %v1446_v14, %v220_v27 }
  0xcf   :  { %v284_v34 = vpop.xlane.xlu0 %283  ;;  %1029 = vrcp.f32 %v367_v10  ;;  %v628_v43 = vmul.f32 1.442695, %v609_v57  ;;  %v1020_v44 = vpop.eup %1019  ;;  %v610_v41 = vsub.f32 0.0, %v594_v39  ;;  %v576_v54 = vmax.f32 %v1611_v0, 0.0 }
  0xd0   :  { %v388_v4 = vmul.f32 %v1018_v18, %v284_v34  ;;  %1031 = vpow2.f32 %v626_v33  ;;  %v595_v46 = vand.u32 2147483647, %v1625_v40  ;;  %v1022_v52 = vpop.eup %1021  ;;  %v577_v58 = vmax.f32 %v1615_v9, 0.0 }
  0xd1   :  { %v338_v47 = vpop.xlane.xlu1 %337  ;;  %1033 = vrcp.f32 %v420_v17  ;;  %v630_v55 = vmul.f32 1.442695, %v610_v41  ;;  %v369_v61 = vmul.f32 %v1417_v1, %v220_v27  ;;  %v222_v2 = vmax.f32 %v1596_v51, 1e-08 }
  0xd2   :  { %v1630_v37 = vsub.f32 %v440_v29, %v388_v4  ;;  %1035 = vpow2.f32 %v628_v43  ;;  %v442_v49 = vmul.f32 %v1020_v44, %v338_v47  ;;  %v611_v28 = vsub.f32 0.0, %v595_v46 }
  0xd3   :  { %v286_v26 = vpop.xlane.xlu0 %285  ;;  %1037 = vrcp.f32 %v368_v15  ;;  %v578_v5 = vmax.f32 %v1621_v24, 0.0  ;;  %v223_v32 = vmax.f32 %v1569_v31, 1e-08  ;;  %v422_v38 = vmul.f32 %v1446_v14, %v221_v25 }
  0xd4   :  { %v596_v56 = vand.u32 2147483647, %v1630_v37  ;;  %v390_v60 = vmul.f32 %v1022_v52, %v286_v26  ;;  %1039 = vpow2.f32 %v630_v55  ;;  %v632_v7 = vmul.f32 1.442695, %v611_v28 }
  0xd5   :  { %1041 = vrcp.f32 %v421_v50  ;;  %v340_v36 = vpop.xlane.xlu1 %339  ;;  %v1650_v51 = vmul.f32 %v1417_v1, %v221_v25  ;;  %v579_v12 = vmax.f32 %v1625_v40, 0.0  ;;  %v580_v17 = vmax.f32 %v1630_v37, 0.0 }
  0xd6   :  { %v612_v62 = vsub.f32 0.0, %v596_v56  ;;  %v1639_v3 = vpop.eup %1023  ;;  %v1642_v6 = vsub.f32 %v442_v49, %v390_v60  ;;  %1043 = vpow2.f32 %v632_v7  ;;  %v1656_v19 = vmul.f32 %v1446_v14, %v222_v2 }
  0xd7   :  { %v1645_v21 = vpop.eup %1025  ;;  %v663_v63 = vadd.f32 1.0, %v1639_v3  ;;  %v288_v8 = vpop.xlane.xlu0 %287  ;;  %1045 = vrcp.f32 %v369_v61  ;;  %v1659_v22 = vmul.f32 %v1417_v1, %v222_v2  ;;  %v1663_v30 = vmul.f32 %v1446_v14, %v223_v32 }
  0xd8   :  { %v1028_v10 = vpop.eup %1027  ;;  %v654_v11 = vadd.f32 1.0, %v1645_v21  ;;  %v634_v13 = vmul.f32 1.442695, %v612_v62  ;;  %v597_v15 = vand.u32 2147483647, %v1642_v6  ;;  %v666_v27 = vmul.f32 -0.5, %v1639_v3 }
  0xd9   :  { %v1030_v31 = vpop.eup %1029  ;;  %1047 = vlog2.f32 %v663_v63  ;;  %v444_v16 = vmul.f32 %v1028_v10, %v340_v36  ;;  %v657_v18 = vmul.f32 -0.5, %v1645_v21  ;;  %v669_v29 = vand.u32 2147483647, %v1639_v3  ;;  %v342_v44 = vpop.xlane.xlu1 %341 }
  0xda   :  { %v1032_v23 = vpop.eup %1031  ;;  %1049 = vlog2.f32 %v654_v11  ;;  %v613_v34 = vsub.f32 0.0, %v597_v15  ;;  %v392_v39 = vmul.f32 %v1030_v31, %v288_v8  ;;  %v660_v4 = vand.u32 2147483647, %v1645_v21 }
  0xdb   :  { %v1034_v53 = vpop.eup %1033  ;;  %v672_v33 = vadd.f32 1.0, %v1032_v23  ;;  %1051 = vrcp.f32 %v422_v38  ;;  %v675_v43 = vmul.f32 -0.5, %v1032_v23  ;;  %v290_v41 = vpop.xlane.xlu0 %289  ;;  %v1676_v50 = vmul.f32 %v1417_v1, %v223_v32 }
  0xdc   :  { %v1667_v57 = vpop.eup %1035  ;;  %1053 = vpow2.f32 %v634_v13  ;;  %v636_v49 = vmul.f32 1.442695, %v613_v34  ;;  %v1673_v26 = vsub.f32 %v392_v39, %v444_v16  ;;  %v667_v55 = vadd.f32 1.0, %v666_v27 }
  0xdd   :  { %1055 = vlog2.f32 %v672_v33  ;;  %v681_v25 = vadd.f32 1.0, %v1667_v57  ;;  %v1038_v46 = vpop.eup %1037  ;;  %v684_v47 = vmul.f32 -0.5, %v1667_v57  ;;  %v658_v28 = vadd.f32 1.0, %v657_v18 }
  0xde   :  { %v1678_v52 = vpop.eup %1039  ;;  %v678_v56 = vand.u32 2147483647, %v1032_v23  ;;  %vm1680_vm9 = vcmp.lt.f32.partialorder %v669_v29, 0.0004427343  ;;  %v446_v62 = vmul.f32 %v1034_v53, %v342_v44  ;;  %v394_v2 = vmul.f32 %v1038_v46, %v290_v41  ;;  %v831_v41 = vld [vmem:[#allocation2 + $0x8] sm:$0xff]  ;;  %v833_v53 = vld [vmem:[#allocation2 + $0x18] sm:$0xff] }
  0xdf   :  { %1057 = vlog2.f32 %v681_v25  ;;  %v1042_v60 = vpop.eup %1041  ;;  %v690_v7 = vadd.f32 1.0, %v1678_v52  ;;  %vm1687_vm10 = vcmp.lt.f32.partialorder %v660_v4, 0.0004427343  ;;  %v676_v36 = vadd.f32 1.0, %v675_v43  ;;  %v292_v61 = vpop.xlane.xlu0 %291 }
  0xe0   :  { %v1685_v63 = vpop.eup %1043  ;;  %1059 = vpow2.f32 %v636_v49  ;;  %v598_v8 = vand.u32 2147483647, %v1673_v26  ;;  %v685_v10 = vadd.f32 1.0, %v684_v47  ;;  %v693_v11 = vmul.f32 -0.5, %v1678_v52 }
  0xe1   :  { %v1046_v38 = vpop.eup %1045  ;;  %1061 = vlog2.f32 %v690_v7  ;;  %v699_v13 = vadd.f32 1.0, %v1685_v63  ;;  %v668_v15 = vmul.f32 %v1639_v3, %v667_v55  ;;  %v659_v16 = vmul.f32 %v1645_v21, %v658_v28  ;;  %v344_v55 = vpop.xlane.xlu1 %343  ;;  %v830_v7 = vld [vmem:[#allocation2] sm:$0xff] }
  0xe2   :  { %vm1696_vm11 = vcmp.lt.f32.partialorder %v678_v56, 0.0004427343  ;;  %v614_v27 = vsub.f32 0.0, %v598_v8  ;;  %v702_v29 = vmul.f32 -0.5, %v1685_v63  ;;  %v1701_v34 = vsub.f32 %v394_v2, %v446_v62 }
  0xe3   :  { %v1048_v31 = vpop.eup %1047  ;;  %1063 = vlog2.f32 %v699_v13  ;;  %v677_v43 = vmul.f32 %v1032_v23, %v676_v36  ;;  %v687_v3 = vand.u32 2147483647, %v1667_v57  ;;  %v696_v21 = vand.u32 2147483647, %v1678_v52 }
  0xe4   :  { %v1050_v18 = vpop.eup %1049  ;;  %v665_v33 = vmul.f32 0.6931472, %v1048_v31  ;;  %v686_v46 = vmul.f32 %v1667_v57, %v685_v10  ;;  %v694_v47 = vadd.f32 1.0, %v693_v11  ;;  %v599_v49 = vand.u32 2147483647, %v1701_v34 }
  0xe5   :  { %v1703_v39 = vpop.eup %1051  ;;  %v656_v4 = vmul.f32 0.6931472, %v1050_v18  ;;  %v638_v2 = vmul.f32 1.442695, %v614_v27  ;;  %v703_v8 = vadd.f32 1.0, %v702_v29  ;;  %v396_v27 = vmul.f32 %v1046_v38, %v292_v61  ;;  %v837_v29 = vld [vmem:[#allocation2 + $0x38] sm:$0xff] }
  0xe6   :  { %v1707_v25 = vpop.eup %1053  ;;  %v671_v44 = vsel %vm1680_vm9, %v668_v15, %v665_v33  ;;  %v705_v10 = vand.u32 2147483647, %v1685_v63  ;;  %v615_v45 = vsub.f32 0.0, %v599_v49  ;;  %v832_v15 = vld [vmem:[#allocation2 + $0x10] sm:$0xff]  ;;  %vm688_vm12 = vcmp.lt.f32.partialorder %v687_v3, 0.0004427343 }
  0xe7   :  { %v1056_v28 = vpop.eup %1055  ;;  %v799_v23 = vadd.f32 %v671_v44, %v575_v20  ;;  %v662_v56 = vsel %vm1687_vm10, %v659_v16, %v656_v4  ;;  %v708_v62 = vadd.f32 1.0, %v1707_v25  ;;  %v448_v20 = vmul.f32 %v1042_v60, %v344_v55  ;;  %v346_v44 = vpop.xlane.xlu1 %345 }
  0xe8   :  { %v798_v36 = vadd.f32 %v662_v56, %v574_v48  ;;  %v674_v57 = vmul.f32 0.6931472, %v1056_v28  ;;  %v711_v48 = vmul.f32 -0.5, %v1707_v25  ;;  %vm1730_vm13 = vcmp.lt.f32.partialorder %v696_v21, 0.0004427343  ;;  %v1745_v55 = vpop.xlane.xlu0 %293 }
  0xe9   :  { %v1058_v11 = vpop.eup %1057  ;;  %v847_v13 = vadd.f32 %v831_v41, %v799_v23  ;;  %1065 = vlog2.f32 %v708_v62  ;;  %v640_v4 = vmul.f32 1.442695, %v615_v45  ;;  %v695_v3 = vmul.f32 %v1678_v52, %v694_v47  ;;  %v834_v52 = vld [vmem:[#allocation2 + $0x20] sm:$0xff]  ;;  %v835_v62 = vld [vmem:[#allocation2 + $0x28] sm:$0xff] }
  0xea   :  { %v846_v31 = vadd.f32 %v830_v7, %v798_v36  ;;  %v680_v32 = vsel %vm1696_vm11, %v677_v43, %v674_v57  ;;  %v683_v16 = vmul.f32 0.6931472, %v1058_v11  ;;  %v1723_v18 = vpop.eup %1059  ;;  %1067 = vpow2.f32 %v638_v2 }
  0xeb   :  { %864 = vst.msk [vmem:[#allocation2 + $0x8] sm:$0xff] %vm16_vm2, %v847_v13  ;;  %v800_v42 = vadd.f32 %v680_v32, %v576_v54  ;;  %v1062_v33 = vpop.eup %1061  ;;  %v717_v38 = vadd.f32 1.0, %v1723_v18  ;;  %v704_v49 = vmul.f32 %v1685_v63, %v703_v8  ;;  %vm1739_vm14 = vcmp.lt.f32.partialorder %v705_v10, 0.0004427343  ;;  %v348_v11 = vpop.xlane.xlu1 %347 }
  0xec   :  { %863 = vst.msk [vmem:[#allocation2] sm:$0xff] %vm16_vm2, %v846_v31  ;;  %v689_v60 = vsel %vm688_vm12, %v686_v46, %v683_v16  ;;  %v692_v54 = vmul.f32 0.6931472, %v1062_v33  ;;  %v1743_v21 = vsub.f32 %v396_v27, %v448_v20  ;;  %v712_v28 = vadd.f32 1.0, %v711_v48  ;;  %v296_v45 = vpop.xlane.xlu0 %295 }
  0xed   :  { %v848_v43 = vadd.f32 %v832_v15, %v800_v42  ;;  %v801_v0 = vadd.f32 %v689_v60, %v577_v58  ;;  %v1064_v41 = vpop.eup %1063  ;;  %1069 = vlog2.f32 %v717_v38  ;;  %v714_v23 = vand.u32 2147483647, %v1707_v25 }
  0xee   :  { %v698_v58 = vsel %vm1730_vm13, %v695_v3, %v692_v54  ;;  %v701_v47 = vmul.f32 0.6931472, %v1064_v41  ;;  %v720_v56 = vmul.f32 -0.5, %v1723_v18  ;;  %1071 = vpow2.f32 %v640_v4 }
  0xef   :  { %865 = vst.msk [vmem:[#allocation2 + $0x10] sm:$0xff] %vm16_vm2, %v848_v43  ;;  %v849_v9 = vadd.f32 %v833_v53, %v801_v0  ;;  %v802_v63 = vadd.f32 %v698_v58, %v578_v5  ;;  %v600_v2 = vand.u32 2147483647, %v1743_v21  ;;  %1073 = vrcp.f32 %v1650_v51  ;;  %v350_v42 = vpop.xlane.xlu1 %349 }
  0xf0   :  { %v707_v7 = vsel %vm1739_vm14, %v704_v49, %v701_v47  ;;  %v224_v61 = vmax.f32 %v1609_v35, 1e-08  ;;  %1075 = vrcp.f32 %v1656_v19  ;;  %v225_v5 = vmax.f32 %v1604_v59, 1e-08  ;;  %v298_v60 = vpop.xlane.xlu0 %297 }
  0xf1   :  { %866 = vst.msk [vmem:[#allocation2 + $0x18] sm:$0xff] %vm16_vm2, %v849_v9  ;;  %v850_v36 = vadd.f32 %v834_v52, %v802_v63  ;;  %v803_v24 = vadd.f32 %v707_v7, %v579_v12  ;;  %v713_v8 = vmul.f32 %v1707_v25, %v712_v28  ;;  %v616_v10 = vsub.f32 0.0, %v600_v2  ;;  %v836_v25 = vld [vmem:[#allocation2 + $0x30] sm:$0xff] }
  0xf2   :  { %1077 = vrcp.f32 %v1659_v22  ;;  %v425_v13 = vmul.f32 %v1446_v14, %v224_v61  ;;  %v426_v40 = vmul.f32 %v1446_v14, %v225_v5  ;;  %vm715_vm15 = vcmp.lt.f32.partialorder %v714_v23, 0.0004427343 }
  0xf3   :  { %v1066_v57 = vpop.eup %1065  ;;  %867 = vst.msk [vmem:[#allocation2 + $0x20] sm:$0xff] %vm16_vm2, %v850_v36  ;;  %v851_v35 = vadd.f32 %v835_v62, %v803_v24  ;;  %1079 = vrcp.f32 %v1663_v30  ;;  %v721_v59 = vadd.f32 1.0, %v720_v56  ;;  %v642_v19 = vmul.f32 1.442695, %v616_v10  ;;  %v352_v58 = vpop.xlane.xlu1 %351 }
  0xf4   :  { %v710_v51 = vmul.f32 0.6931472, %v1066_v57  ;;  %v1770_v12 = vpop.eup %1067  ;;  %1081 = vrcp.f32 %v1676_v50  ;;  %v723_v20 = vand.u32 2147483647, %v1723_v18  ;;  %v373_v14 = vmul.f32 %v1417_v1, %v224_v61  ;;  %v300_v63 = vpop.xlane.xlu0 %299 }
  0xf5   :  { %868 = vst.msk [vmem:[#allocation2 + $0x28] sm:$0xff] %vm16_vm2, %v851_v35  ;;  %v726_v31 = vadd.f32 1.0, %v1770_v12  ;;  %1083 = vpow2.f32 %v642_v19  ;;  %v581_v16 = vmax.f32 %v1642_v6, 0.0  ;;  %v722_v27 = vmul.f32 %v1723_v18, %v721_v59 }
  0xf6   :  { %v716_v22 = vsel %vm715_vm15, %v713_v8, %v710_v51  ;;  %vm724_vm0 = vcmp.lt.f32.partialorder %v723_v20, 0.0004427343  ;;  %v450_v33 = vmul.f32 %v1703_v39, %v346_v44  ;;  %v374_v37 = vmul.f32 %v1417_v1, %v225_v5  ;;  %v838_v51 = vld [vmem:[#allocation2 + $0x40] sm:$0xff] }
  0xf7   :  { %v804_v30 = vadd.f32 %v716_v22, %v580_v17  ;;  %v1070_v32 = vpop.eup %1069  ;;  %1085 = vlog2.f32 %v726_v31  ;;  %v729_v6 = vmul.f32 -0.5, %v1770_v12  ;;  %v732_v46 = vand.u32 2147483647, %v1770_v12  ;;  %v354_v59 = vpop.xlane.xlu1 %353 }
  0xf8   :  { %v719_v50 = vmul.f32 0.6931472, %v1070_v32  ;;  %v1781_v48 = vpop.eup %1071  ;;  %1087 = vrcp.f32 %v425_v13  ;;  %v582_v7 = vmax.f32 %v1673_v26, 0.0  ;;  %v583_v26 = vmax.f32 %v1701_v34, 0.0  ;;  %v302_v20 = vpop.xlane.xlu0 %301 }
  0xf9   :  { %v852_v15 = vadd.f32 %v836_v25, %v804_v30  ;;  %v1074_v17 = vpop.eup %1073  ;;  %v735_v38 = vadd.f32 1.0, %v1781_v48  ;;  %1089 = vrcp.f32 %v373_v14  ;;  %v730_v49 = vadd.f32 1.0, %v729_v6 }
  0xfa   :  { %v725_v53 = vsel %vm724_vm0, %v722_v27, %v719_v50  ;;  %v1076_v18 = vpop.eup %1075  ;;  %v398_v43 = vmul.f32 %v1074_v17, %v1745_v55  ;;  %1091 = vrcp.f32 %v426_v40  ;;  %v738_v55 = vmul.f32 -0.5, %v1781_v48 }
  0xfb   :  { %869 = vst.msk [vmem:[#allocation2 + $0x30] sm:$0xff] %vm16_vm2, %v852_v15  ;;  %v805_v4 = vadd.f32 %v725_v53, %v581_v16  ;;  %1093 = vlog2.f32 %v735_v38  ;;  %v452_v0 = vmul.f32 %v1076_v18, %v348_v11  ;;  %v741_v62 = vand.u32 2147483647, %v1781_v48  ;;  %v839_v53 = vld [vmem:[#allocation2 + $0x48] sm:$0xff] }
  0xfc   :  { %v1078_v39 = vpop.eup %1077  ;;  %v1789_v3 = vsub.f32 %v398_v43, %v450_v33  ;;  %1095 = vrcp.f32 %v374_v37  ;;  %v731_v24 = vmul.f32 %v1770_v12, %v730_v49  ;;  %vm733_vm1 = vcmp.lt.f32.partialorder %v732_v46, 0.0004427343 }
  0xfd   :  { %v1080_v54 = vpop.eup %1079  ;;  %v853_v1 = vadd.f32 %v837_v29, %v805_v4  ;;  %v400_v44 = vmul.f32 %v1078_v39, %v296_v45  ;;  %v739_v10 = vadd.f32 1.0, %v738_v55  ;;  %vm1805_vm3 = vcmp.lt.f32.partialorder %v741_v62, 0.0004427343 }
  0xfe   :  { %v1082_v41 = vpop.eup %1081  ;;  %v454_v9 = vmul.f32 %v1080_v54, %v350_v42  ;;  %v601_v52 = vand.u32 2147483647, %v1789_v3  ;;  %v584_v49 = vmax.f32 %v1743_v21, 0.0  ;;  %v882_v21 = vld [vmem:[#allocation2] sm:$0xff]  ;;  %vm937_vm10 = vcmask 0  }
  0xff   :  { %870 = vst.msk [vmem:[#allocation2 + $0x38] sm:$0xff] %vm16_vm2, %v853_v1  ;;  %v1795_v47 = vsub.f32 %v400_v44, %v452_v0  ;;  %v402_v28 = vmul.f32 %v1082_v41, %v298_v60  ;;  %v1084_v23 = vpop.eup %1083  ;;  %v740_v27 = vmul.f32 %v1781_v48, %v739_v10 }
 0x100   :  { %v744_v2 = vadd.f32 1.0, %v1084_v23  ;;  %v617_v61 = vsub.f32 0.0, %v601_v52  ;;  %v747_v30 = vmul.f32 -0.5, %v1084_v23  ;;  %v750_v18 = vand.u32 2147483647, %v1084_v23 }
 0x101   :  { %v1086_v56 = vpop.eup %1085  ;;  %v602_v5 = vand.u32 2147483647, %v1795_v47  ;;  %v1801_v57 = vsub.f32 %v402_v28, %v454_v9 }
 0x102   :  { %v728_v36 = vmul.f32 0.6931472, %v1086_v56  ;;  %v1088_v8 = vpop.eup %1087  ;;  %1097 = vlog2.f32 %v744_v2  ;;  %v644_v11 = vmul.f32 1.442695, %v617_v61  ;;  %v748_v6 = vadd.f32 1.0, %v747_v30  ;;  %v883_v61 = vld [vmem:[#allocation2 + $0x8] sm:$0xff] }
 0x103   :  { %v1090_v13 = vpop.eup %1089  ;;  %v618_v45 = vsub.f32 0.0, %v602_v5  ;;  %v603_v40 = vand.u32 2147483647, %v1801_v57  ;;  %v456_v25 = vmul.f32 %v1088_v8, %v352_v58  ;;  %vm751_vm4 = vcmp.lt.f32.partialorder %v750_v18, 0.0004427343  ;;  %v840_v58 = vld [vmem:[#allocation2 + $0x50] sm:$0xff] }
 0x104   :  { %v734_v35 = vsel %vm733_vm1, %v731_v24, %v728_v36  ;;  %v1092_v19 = vpop.eup %1091  ;;  %1099 = vpow2.f32 %v644_v11  ;;  %v404_v15 = vmul.f32 %v1090_v13, %v300_v63  ;;  %v749_v1 = vmul.f32 %v1084_v23, %v748_v6  ;;  %v884_v5 = vld [vmem:[#allocation2 + $0x10] sm:$0xff]  ;;  %v842_v18 = vld [vmem:[#allocation2 + $0x60] sm:$0xff] }
 0x105   :  { %v806_v12 = vadd.f32 %v734_v35, %v582_v7  ;;  %v1094_v31 = vpop.eup %1093  ;;  %v646_v14 = vmul.f32 1.442695, %v618_v45  ;;  %v619_v32 = vsub.f32 0.0, %v603_v40  ;;  %v458_v42 = vmul.f32 %v1092_v19, %v354_v59  ;;  %v885_v40 = vld [vmem:[#allocation2 + $0x18] sm:$0xff] }
 0x106   :  { %v1096_v16 = vpop.eup %1095  ;;  %v737_v50 = vmul.f32 0.6931472, %v1094_v31  ;;  %v1810_v60 = vsub.f32 %v404_v15, %v456_v25  ;;  %v898_v11 = vsel %vm16_vm2, %v882_v21, 0.0  ;;  %v899_v13 = vsel %vm16_vm2, %v883_v61, 0.0  ;;  %v841_v15 = vld [vmem:[#allocation2 + $0x58] sm:$0xff] }
 0x107   :  { %v854_v34 = vadd.f32 %v838_v51, %v806_v12  ;;  %1101 = vpow2.f32 %v646_v14  ;;  %v648_v33 = vmul.f32 1.442695, %v619_v32  ;;  %v406_v37 = vmul.f32 %v1096_v16, %v302_v20 }
 0x108   :  { %v743_v17 = vsel %vm1805_vm3, %v740_v27, %v737_v50  ;;  %v604_v38 = vand.u32 2147483647, %v1810_v60  ;;  %v901_v59 = vsel %vm16_vm2, %v884_v5, 0.0  ;;  %v900_v25 = vadd.f32 %v899_v13, %v898_v11 }
 0x109   :  { %871 = vst.msk [vmem:[#allocation2 + $0x40] sm:$0xff] %vm16_vm2, %v854_v34  ;;  %v807_v29 = vadd.f32 %v743_v17, %v583_v26  ;;  %1103 = vpow2.f32 %v648_v33  ;;  %v1816_v4 = vsub.f32 %v406_v37, %v458_v42  ;;  %v585_v31 = vmax.f32 %v1789_v3, 0.0  ;;  %v886_v37 = vld [vmem:[#allocation2 + $0x20] sm:$0xff] }
 0x10a   :  { %v620_v43 = vsub.f32 0.0, %v604_v38  ;;  %v903_v50 = vsel %vm16_vm2, %v885_v40, 0.0  ;;  %v902_v17 = vadd.f32 %v901_v59, %v900_v25 }
 0x10b   :  { %v855_v48 = vadd.f32 %v839_v53, %v807_v29  ;;  %v605_v0 = vand.u32 2147483647, %v1816_v4  ;;  %v586_v29 = vmax.f32 %v1795_v47, 0.0  ;;  %v843_v47 = vld [vmem:[#allocation2 + $0x68] sm:$0xff] }
 0x10c   :  { %v1098_v39 = vpop.eup %1097  ;;  %v650_v44 = vmul.f32 1.442695, %v620_v43 }
 0x10d   :  { %872 = vst.msk [vmem:[#allocation2 + $0x48] sm:$0xff] %vm16_vm2, %v855_v48  ;;  %v746_v54 = vmul.f32 0.6931472, %v1098_v39  ;;  %v621_v46 = vsub.f32 0.0, %v605_v0  ;;  %v887_v39 = vld [vmem:[#allocation2 + $0x28] sm:$0xff] }
 0x10e   :  { %v1100_v41 = vpop.eup %1099  ;;  %1105 = vpow2.f32 %v650_v44 }
 0x10f   :  { %v752_v9 = vsel %vm751_vm4, %v749_v1, %v746_v54  ;;  %v753_v55 = vadd.f32 1.0, %v1100_v41  ;;  %v652_v28 = vmul.f32 1.442695, %v621_v46  ;;  %v756_v23 = vmul.f32 -0.5, %v1100_v41 }
 0x110   :  { %v808_v52 = vadd.f32 %v752_v9, %v584_v49  ;;  %v759_v8 = vand.u32 2147483647, %v1100_v41  ;;  %v587_v54 = vmax.f32 %v1801_v57, 0.0  ;;  %v905_v1 = vsel %vm16_vm2, %v886_v37, 0.0  ;;  %v888_v49 = vld [vmem:[#allocation2 + $0x30] sm:$0xff] }
 0x111   :  { %v1102_v63 = vpop.eup %1101  ;;  %1107 = vlog2.f32 %v753_v55  ;;  %v757_v24 = vadd.f32 1.0, %v756_v23  ;;  %v904_v46 = vadd.f32 %v903_v50, %v902_v17 }
 0x112   :  { %v856_v56 = vadd.f32 %v840_v58, %v808_v52  ;;  %v762_v7 = vadd.f32 1.0, %v1102_v63  ;;  %1109 = vpow2.f32 %v652_v28  ;;  %v765_v36 = vmul.f32 -0.5, %v1102_v63 }
 0x113   :  { %v1104_v62 = vpop.eup %1103  ;;  %v758_v12 = vmul.f32 %v1100_v41, %v757_v24  ;;  %v768_v22 = vand.u32 2147483647, %v1102_v63  ;;  %vm760_vm5 = vcmp.lt.f32.partialorder %v759_v8, 0.0004427343  ;;  %v907_v52 = vsel %vm16_vm2, %v887_v39, 0.0 }
 0x114   :  { %873 = vst.msk [vmem:[#allocation2 + $0x50] sm:$0xff] %vm16_vm2, %v856_v56  ;;  %1111 = vlog2.f32 %v762_v7  ;;  %v771_v2 = vadd.f32 1.0, %v1104_v62  ;;  %v774_v10 = vmul.f32 -0.5, %v1104_v62  ;;  %v766_v26 = vadd.f32 1.0, %v765_v36 }
 0x115   :  { %v777_v16 = vand.u32 2147483647, %v1104_v62  ;;  %vm769_vm6 = vcmp.lt.f32.partialorder %v768_v22, 0.0004427343  ;;  %v906_v57 = vadd.f32 %v905_v1, %v904_v46  ;;  %v909_v7 = vsel %vm16_vm2, %v888_v49, 0.0 }
 0x116   :  { %1113 = vlog2.f32 %v771_v2  ;;  %v775_v30 = vadd.f32 1.0, %v774_v10  ;;  %v767_v33 = vmul.f32 %v1102_v63, %v766_v26  ;;  %v889_v63 = vld [vmem:[#allocation2 + $0x38] sm:$0xff]  ;;  %v890_v2 = vld [vmem:[#allocation2 + $0x40] sm:$0xff]  ;;  %v588_v8 = vmax.f32 %v1810_v60, 0.0  ;;  %v891_v10 = vld [vmem:[#allocation2 + $0x48] sm:$0xff] }
 0x117   :  { %vm778_vm7 = vcmp.lt.f32.partialorder %v777_v16, 0.0004427343  ;;  %v908_v21 = vadd.f32 %v907_v52, %v906_v57  ;;  %v911_v5 = vsel %vm16_vm2, %v889_v63, 0.0  ;;  %v844_v26 = vld [vmem:[#allocation2 + $0x70] sm:$0xff]  ;;  %v589_v22 = vmax.f32 %v1816_v4, 0.0 }
 0x118   :  { %v1824_v35 = vpop.eup %1105  ;;  %v776_v43 = vmul.f32 %v1104_v62, %v775_v30  ;;  %v915_v25 = vsel %vm16_vm2, %v891_v10, 0.0  ;;  %v845_v30 = vld [vmem:[#allocation2 + $0x78] sm:$0xff] }
 0x119   :  { %v780_v45 = vadd.f32 1.0, %v1824_v35  ;;  %v783_v3 = vmul.f32 -0.5, %v1824_v35  ;;  %v786_v28 = vand.u32 2147483647, %v1824_v35  ;;  %v910_v11 = vadd.f32 %v909_v7, %v908_v21 }
 0x11b   :  { %v1108_v51 = vpop.eup %1107  ;;  %1115 = vlog2.f32 %v780_v45  ;;  %v784_v55 = vadd.f32 1.0, %v783_v3  ;;  %vm787_vm8 = vcmp.lt.f32.partialorder %v786_v28, 0.0004427343  ;;  %v913_v45 = vsel %vm16_vm2, %v890_v2, 0.0 }
 0x11c   :  { %v755_v19 = vmul.f32 0.6931472, %v1108_v51  ;;  %v1828_v20 = vpop.eup %1109 }
 0x11d   :  { %v789_v34 = vadd.f32 1.0, %v1828_v20  ;;  %v792_v41 = vmul.f32 -0.5, %v1828_v20  ;;  %v785_v36 = vmul.f32 %v1824_v35, %v784_v55  ;;  %v795_v24 = vand.u32 2147483647, %v1828_v20 }
 0x11e   :  { %v1112_v14 = vpop.eup %1111  ;;  %v761_v32 = vsel %vm760_vm5, %v758_v12, %v755_v19  ;;  %v892_v12 = vld [vmem:[#allocation2 + $0x50] sm:$0xff]  ;;  %v912_v35 = vadd.f32 %v911_v5, %v910_v11 }
 0x11f   :  { %v809_v27 = vadd.f32 %v761_v32, %v585_v31  ;;  %v764_v42 = vmul.f32 0.6931472, %v1112_v14  ;;  %1117 = vlog2.f32 %v789_v34  ;;  %v793_v23 = vadd.f32 1.0, %v792_v41 }
 0x120   :  { %v1114_v53 = vpop.eup %1113  ;;  %vm796_vm9 = vcmp.lt.f32.partialorder %v795_v24, 0.0004427343  ;;  %v914_v32 = vadd.f32 %v913_v45, %v912_v35  ;;  %v917_v16 = vsel %vm16_vm2, %v892_v12, 0.0 }
 0x121   :  { %v857_v6 = vadd.f32 %v841_v15, %v809_v27  ;;  %v770_v38 = vsel %vm769_vm6, %v767_v33, %v764_v42  ;;  %v773_v48 = vmul.f32 0.6931472, %v1114_v53  ;;  %v794_v19 = vmul.f32 %v1828_v20, %v793_v23 }
 0x122   :  { %v810_v0 = vadd.f32 %v770_v38, %v586_v29  ;;  %v916_v50 = vadd.f32 %v915_v25, %v914_v32 }
 0x123   :  { %874 = vst.msk [vmem:[#allocation2 + $0x58] sm:$0xff] %vm16_vm2, %v857_v6  ;;  %v779_v44 = vsel %vm778_vm7, %v776_v43, %v773_v48 }
 0x124   :  { %v858_v9 = vadd.f32 %v842_v18, %v810_v0  ;;  %v811_v58 = vadd.f32 %v779_v44, %v587_v54  ;;  %v918_v4 = vadd.f32 %v917_v16, %v916_v50 }
 0x125   :  { %v1116_v62 = vpop.eup %1115 }
 0x126   :  { %875 = vst.msk [vmem:[#allocation2 + $0x60] sm:$0xff] %vm16_vm2, %v858_v9  ;;  %v859_v56 = vadd.f32 %v843_v47, %v811_v58  ;;  %v782_v61 = vmul.f32 0.6931472, %v1116_v62 }
 0x128   :  { %876 = vst.msk [vmem:[#allocation2 + $0x68] sm:$0xff] %vm16_vm2, %v859_v56  ;;  %v788_v51 = vsel %vm787_vm8, %v785_v36, %v782_v61 }
 0x129   :  { %v1118_v13 = vpop.eup %1117  ;;  %v812_v40 = vadd.f32 %v788_v51, %v588_v8 }
 0x12a   :  { %v791_v59 = vmul.f32 0.6931472, %v1118_v13  ;;  %v893_v14 = vld [vmem:[#allocation2 + $0x58] sm:$0xff] }
 0x12b   :  { %v860_v60 = vadd.f32 %v844_v26, %v812_v40  ;;  %v919_v27 = vsel %vm16_vm2, %v893_v14, 0.0 }
 0x12c   :  { %v797_v31 = vsel %vm796_vm9, %v794_v19, %v791_v59  ;;  %v920_v37 = vadd.f32 %v919_v27, %v918_v4 }
 0x12d   :  { %v813_v15 = vadd.f32 %v797_v31, %v589_v22  ;;  %877 = vst.msk [vmem:[#allocation2 + $0x70] sm:$0xff] %vm16_vm2, %v860_v60  ;;  %v894_v34 = vld [vmem:[#allocation2 + $0x60] sm:$0xff] }
 0x12e   :  { %v921_v33 = vsel %vm16_vm2, %v894_v34, 0.0 }
 0x12f   :  { %v861_v20 = vadd.f32 %v845_v30, %v813_v15  ;;  %v895_v42 = vld [vmem:[#allocation2 + $0x68] sm:$0xff]  ;;  %v922_v53 = vadd.f32 %v921_v33, %v920_v37 }
 0x130   :  { %v923_v17 = vsel %vm16_vm2, %v895_v42, 0.0 }
 0x131   :  { %878 = vst.msk [vmem:[#allocation2 + $0x78] sm:$0xff] %vm16_vm2, %v861_v20  ;;  %v924_v3 = vadd.f32 %v923_v17, %v922_v53 }
 0x134   :  { %v896_v29 = vld [vmem:[#allocation2 + $0x70] sm:$0xff] }
 0x135   :  { %v925_v6 = vsel %vm16_vm2, %v896_v29, 0.0 }
 0x136   :  { %v926_v18 = vadd.f32 %v925_v6, %v924_v3 }
 0x138   :  { %v897_v38 = vld [vmem:[#allocation2 + $0x78] sm:$0xff] }
 0x139   :  { %v927_v48 = vsel %vm16_vm2, %v897_v38, 0.0 }
 0x13a   :  { %v928_v43 = vadd.f32 %v927_v48, %v926_v18 }
 0x13c   :  { %v929_v39 = vrot.slane %v928_v43, 4 }
 0x13e   :  { %v930_v0 = vadd.f32 %v929_v39, %v928_v43 }
 0x140   :  { %v931_v54 = vrot.slane %v930_v0, 2 }
 0x142   :  { %v932_v1 = vadd.f32 %v931_v54, %v930_v0 }
 0x144   :  { %v933_v44 = vrot.slane %v932_v1, 1 }
 0x146   :  { %v934_v47 = vadd.f32 %v933_v44, %v932_v1 }
 0x148   :  { %v936_v41 = vmul.f32 0.0078125, %v934_v47 }
 0x14a   :  { %938 = vst.msk [vmem:[#allocation3] sm:$0x1] %vm937_vm10, %v936_v41 }
 0x14b   :  { %1130 = shalt.err (!%p1127_p4)
}
 0x14c   :  { %s1131_s18 = scalar_lea.hbm %s1874_s2, 16 }
 0x14d   :  { %p1132_p5 = scmp.ne.s32.totalorder %s1874_s2, %s1131_s18  ;;  %p1135_p6 = scmp.lt.u32.totalorder %s1131_s18, %s1874_s2 }
 0x14f   :  { %p1137_p7 = pnand %p1135_p6, %p1132_p5 }
 0x151   :  { %1140 = shalt.err (!%p1137_p7)
}
 0x152   :  { %948 = dma.vmem_to_hbm [thread:$0]  %s946_s14, 16, %s1874_s2, [#allocation4]  }
 0x153   :  { %1141 = dma.done.wait [#allocation4], 16  }
 0x154   :  { %1142 = vsyncadd [#allocation4], 4294967280 }
 0x155   :  { %952 = vsyncpa [#allocation4], 1 }

</bundles_post_ra>
